<compile_context>
chip_gen: v6e
topology: v6e:2x2x1
jax: 0.10.0
libtpu: 0.0.40
codegen_flags: <defaults>
</compile_context>

<pallas_src>
import jax
import jax.numpy as jnp
from jax import lax
from jax.experimental import pallas as pl
from jax.experimental.pallas import tpu as pltpu


# ----------------------------------------------------------------------------
# Kernels
# ----------------------------------------------------------------------------
def _simple_kernel(x_ref, w_ref, b_ref, o_ref):
    """Single F block: whole feature dim contracted in one step."""
    # x_ref: (tile_n, F)  w_ref: (1, F)  b_ref: (1,) SMEM  o_ref: (1, tile_n)
    z = lax.dot_general(
        w_ref[...], x_ref[...],
        dimension_numbers=(((1,), (1,)), ((), ())),   # contract F with F -> (1, tile_n)
        preferred_element_type=jnp.float32,
    )
    z = z + b_ref[0]
    o_ref[...] = jax.nn.sigmoid(z).astype(o_ref.dtype)


def _make_acc_kernel(n_k, tile_f, f_total, needs_mask):
    """F split over an 'arbitrary' grid axis with a (1, tile_n) f32 accumulator."""

    def kernel(x_ref, w_ref, b_ref, o_ref, acc_ref):
        k = pl.program_id(1)

        @pl.when(k == 0)
        def _():
            acc_ref[...] = jnp.zeros_like(acc_ref)

        x = x_ref[...]
        if needs_mask:
            # Last F block is ragged: columns >= f_total hold unspecified data (could be
            # NaN) -> zero them before the dot. Cheap VPU select; kernel is HBM-bound.
            col = k * tile_f + lax.broadcasted_iota(jnp.int32, x.shape, 1)
            x = jnp.where(col < f_total, x, jnp.zeros_like(x))

        acc_ref[...] += lax.dot_general(
            w_ref[...], x,
            dimension_numbers=(((1,), (1,)), ((), ())),
            preferred_element_type=jnp.float32,
        )

        @pl.when(k == n_k - 1)
        def _():
            z = acc_ref[...] + b_ref[0]
            o_ref[...] = jax.nn.sigmoid(z).astype(o_ref.dtype)

    return kernel


# ----------------------------------------------------------------------------
# Wrapper
# ----------------------------------------------------------------------------
def logistic_forward(x, weight, bias, *, tile_n=None, _force_tile_f=None):
    """x: (N, F), weight: (1, F) (PyTorch nn.Linear layout), bias: (1,) -> (N, 1) f32."""
    N, F = x.shape
    assert weight.shape == (1, F) and bias.shape == (1,)

    itemsize = x.dtype.itemsize
    weight = weight.astype(x.dtype)        # tiny cast; keeps MXU input dtypes matched (bf16 path)
    bias = bias.astype(jnp.float32)

    # --- per-generation VMEM budget ------------------------------------------------
    try:
        vmem_cap = int(pltpu.get_tpu_info().vmem_capacity_bytes)
    except Exception:
        vmem_cap = 64 * 1024 * 1024
    if vmem_cap >= 100 * 1024 * 1024:       # v5e / v6e: 128 MiB per core
        x_budget = 64 * 1024 * 1024
        vmem_limit = 96 * 1024 * 1024
    else:                                    # v7x: 64 MiB per TensorCore
        x_budget = 24 * 1024 * 1024
        vmem_limit = 48 * 1024 * 1024

    target_tile_bytes = 8 * 1024 * 1024      # MiB-scale tiles amortize ~0.35 us/step overhead

    # --- feature (K) tiling ----------------------------------------------------------
    F_pad = pl.cdiv(F, 128) * 128            # lane-padded VMEM footprint of one row
    # Largest F slab that still fits double-buffered with the minimum 128-row tile.
    max_tile_f = max(128, (x_budget // (2 * 128 * itemsize)) // 128 * 128)

    if _force_tile_f is not None and _force_tile_f < F:
        tile_f = _force_tile_f               # testing hook for the F-split path
    elif F_pad <= max_tile_f:
        tile_f = F                           # single K step; full (ragged) last dim is legal
    else:
        tile_f = max_tile_f                  # wide-F: split, multiple of 128 by construction

    n_k = pl.cdiv(F, tile_f)
    if n_k == 1:
        f_cols_vmem = F_pad
        needs_mask = False
    else:
        assert tile_f % 128 == 0
        f_cols_vmem = tile_f
        needs_mask = (F % tile_f) != 0
        if needs_mask:
            # Pad the tiny weight row so every (1, tile_f) weight block is in bounds
            # (and zero beyond F). x itself is never padded / copied.
            weight = jnp.pad(weight, ((0, 0), (0, n_k * tile_f - F)))

    # --- batch (N) tiling --------------------------------------------------------------
    bytes_per_row = f_cols_vmem * itemsize
    rows_target = max(128, target_tile_bytes // bytes_per_row)
    rows_budget = max(128, x_budget // (2 * bytes_per_row))
    rows = min(rows_target, rows_budget)
    if tile_n is not None:
        rows = min(rows, max(128, tile_n))
    # Keep >= ~4 batch grid steps when N allows so v7x megacore can split the grid.
    rows_for_steps = max(128, ((pl.cdiv(N, 4) + 127) // 128) * 128)
    rows = min(rows, rows_for_steps)
    tile_n = max(128, (rows // 128) * 128)   # lane-dense (1, tile_n) output needs %128 == 0
    n_i = pl.cdiv(N, tile_n)

    # --- kernel / scratch selection ------------------------------------------------------
    if n_k == 1:
        kernel = _simple_kernel
        scratch = []
    else:
        kernel = _make_acc_kernel(n_k, tile_f, F, needs_mask)
        scratch = [pltpu.VMEM((1, tile_n), jnp.float32)]

    out_row = pl.pallas_call(
        kernel,
        out_shape=jax.ShapeDtypeStruct((1, N), jnp.float32),
        grid_spec=pltpu.PrefetchScalarGridSpec(
            num_scalar_prefetch=0,
            grid=(n_i, n_k),
            in_specs=[
                pl.BlockSpec((tile_n, tile_f), lambda i, k: (i, k)),   # x: pipelined tiles
                pl.BlockSpec((1, tile_f), lambda i, k: (0, k)),        # weight: VMEM resident
                pl.BlockSpec(memory_space=pltpu.MemorySpace.SMEM),     # bias: SMEM scalar
            ],
            out_specs=pl.BlockSpec((1, tile_n), lambda i, k: (0, i)),  # lane-dense output
            scratch_shapes=scratch,
        ),
        compiler_params=pltpu.CompilerParams(
            dimension_semantics=("parallel", "arbitrary"),   # batch parallel, F reduction
            vmem_limit_bytes=vmem_limit,
        ),
        cost_estimate=pl.CostEstimate(
            flops=2 * N * F,
            transcendentals=N,
            bytes_accessed=N * F * itemsize + weight.size * itemsize + 4 + N * 4,
        ),
    )(x, weight, bias)

    return out_row[0, :].reshape(N, 1)


# ----------------------------------------------------------------------------
# Demo / correctness check
# ----------------------------------------------------------------------------
if __name__ == "__main__":
    key = jax.random.PRNGKey(0)
    kx, kw, kb, kx2, kw2 = jax.random.split(key, 5)

    # Case 1: N=300, F=32 -> single F block, ragged batch (exercises masked partial
    # input reads / output stores with NO jnp.pad copy of x).
    N, F = 300, 32
    x = jax.random.normal(kx, (N, F), dtype=jnp.float32)
    bound = 1.0 / (F ** 0.5)
    weight = jax.random.uniform(kw, (1, F), minval=-bound, maxval=bound, dtype=jnp.float32)
    bias = jax.random.uniform(kb, (1,), minval=-bound, maxval=bound, dtype=jnp.float32)

    y = jax.block_until_ready(logistic_forward(x, weight, bias))
    y_ref = jax.nn.sigmoid(x @ weight.T + bias)
    assert y.shape == (N, 1)
    assert jnp.allclose(y, y_ref, atol=1e-5, rtol=1e-5), float(jnp.max(jnp.abs(y - y_ref)))

    # Case 2: force the wide-F accumulator path (F split into 128-col blocks with a
    # ragged last block) at small shapes to validate the pl.when init/finalize logic.
    N2, F2 = 300, 200
    x2 = jax.random.normal(kx2, (N2, F2), dtype=jnp.float32)
    bound2 = 1.0 / (F2 ** 0.5)
    weight2 = jax.random.uniform(kw2, (1, F2), minval=-bound2, maxval=bound2, dtype=jnp.float32)
    y2 = jax.block_until_ready(logistic_forward(x2, weight2, bias, _force_tile_f=128))
    y2_ref = jax.nn.sigmoid(x2 @ weight2.T + bias)
    assert y2.shape == (N2, 1)
    assert jnp.allclose(y2, y2_ref, atol=1e-5, rtol=1e-5), float(jnp.max(jnp.abs(y2 - y2_ref)))

    print("KERNEL_OK")
</pallas_src>

<mosaic_0001>
module attributes {stable_mosaic.version = 11 : i64} {
  func.func @_simple_kernel(%arg0: i32, %arg1: i32, %arg2: memref<128x32xf32, #tpu.memory_space<vmem>>, %arg3: memref<1x32xf32, #tpu.memory_space<vmem>>, %arg4: memref<1xf32, #tpu.memory_space<smem>>, %arg5: memref<1x128xf32, #tpu.memory_space<vmem>>) attributes {dimension_semantics = [#tpu.dimension_semantics<parallel>, #tpu.dimension_semantics<arbitrary>], iteration_bounds = array<i64: 3, 1>, scalar_prefetch = 0 : i64, scratch_operands = 0 : i64, tpu.core_type = #tpu.core_type<tc>, window_params = [{transform_indices = @transform_0, window_bounds = array<i64: 128, 32>}, {transform_indices = @transform_1, window_bounds = array<i64: 1, 32>}, {transform_indices = @transform_2, window_bounds = array<i64: 1>}, {transform_indices = @transform_3, window_bounds = array<i64: 1, 128>}]} {
    %c0 = arith.constant 0 : index
    %c0_0 = arith.constant 0 : index
    %0 = vector.load %arg3[%c0, %c0_0] : memref<1x32xf32, #tpu.memory_space<vmem>>, vector<1x32xf32>
    %c0_1 = arith.constant 0 : index
    %c0_2 = arith.constant 0 : index
    %1 = vector.load %arg2[%c0_1, %c0_2] : memref<128x32xf32, #tpu.memory_space<vmem>>, vector<128x32xf32>
    %cst = arith.constant dense<0.000000e+00> : vector<1x128xf32>
    %2 = tpu.matmul %0, %1, %cst {dimension_numbers = #tpu.dot_dimension_numbers<[1], [1], [0], [0], [0, 0, 1, 0], [], []>} : vector<1x32xf32>, vector<128x32xf32>, vector<1x128xf32> -> vector<1x128xf32>
    %c0_3 = arith.constant 0 : index
    %3 = memref.load %arg4[%c0_3] : memref<1xf32, #tpu.memory_space<smem>>
    %4 = vector.broadcast %3 : f32 to vector<1x128xf32>
    %5 = arith.addf %2, %4 : vector<1x128xf32>
    %6 = arith.negf %5 : vector<1x128xf32>
    %7 = math.exp %6 : vector<1x128xf32>
    %cst_4 = arith.constant 1.000000e+00 : f32
    %8 = vector.broadcast %cst_4 : f32 to vector<1x128xf32>
    %9 = arith.addf %8, %7 : vector<1x128xf32>
    %10 = arith.divf %8, %9 : vector<1x128xf32>
    %c0_5 = arith.constant 0 : index
    %c0_6 = arith.constant 0 : index
    %11 = vector.load %arg5[%c0_5, %c0_6] : memref<1x128xf32, #tpu.memory_space<vmem>>, vector<1x128xf32>
    tpu.vector_store %arg5[%c0_5, %c0_6], %10 {strides = array<i32>} : memref<1x128xf32, #tpu.memory_space<vmem>>, vector<1x128xf32>,
    return
  }
  func.func @transform_0(%arg0: i32, %arg1: i32) -> (i32, i32) {
    %c0_i32 = arith.constant 0 : i32
    return %arg0, %arg1 : i32, i32
  }
  func.func @transform_1(%arg0: i32, %arg1: i32) -> (i32, i32) {
    %c0_i32 = arith.constant 0 : i32
    %c0_i32_0 = arith.constant 0 : i32
    return %c0_i32, %arg1 : i32, i32
  }
  func.func @transform_2(%arg0: i32, %arg1: i32) -> i32 {
    %c0_i32 = arith.constant 0 : i32
    %c0_i32_0 = arith.constant 0 : i32
    return %c0_i32 : i32
  }
  func.func @transform_3(%arg0: i32, %arg1: i32) -> (i32, i32) {
    %c0_i32 = arith.constant 0 : i32
    %c0_i32_0 = arith.constant 0 : i32
    return %c0_i32, %arg0 : i32, i32
  }
}

</mosaic_0001>

<bundles_post_ra>
// kernel: tpu_custom_call.1
= control target key start
LH: loop header
LB: loop body
LE: loop exit
PB: predicated region body
PF: predicated region fallthrough
CT: control target
= control target key end

     0   :  { %s856_s0 = inlined_call_operand.vmem [shape: f32[300,32], index: 0, kind: input, shape index: {}]   ;;  %s857_s1 = inlined_call_operand.vmem [shape: f32[1,32], index: 1, kind: input, shape index: {}]   ;;  %s858_s2 = inlined_call_operand.<no memory space> [shape: f32[1], index: 2, kind: input, shape index: {}]   ;;  %s859_s3 = inlined_call_operand.hbm [shape: f32[1,300], index: 3, kind: output, shape index: {}]  }
   0x1   :  { %8 = sst [smem:[#allocation2]] %s858_s2 }
   0x2   :  { %9 = vsyncpa [#allocation4], 0 }
   0x3   :  { %11 = vsyncpa [#allocation4 + $0x1], 0  ;;  %s713_s14 = smov 0   ;;  %s715_s15 = smov 0  }
   0x4   :  { %s717_s16 = smov 0   ;;  %s719_s17 = smov 0  }
   0x5   :  { %s721_s18 = smov 0   ;;  %s723_s19 = smov 0  }
   0x6 LB: > { %s467_s2 = sadd.s32 4294967295, %s685_s19   ;;  %s468_s20 = sadd.s32 4294967294, %s685_s19   ;;  %s685_s19 = sphi %s723_s19, %s17_s19   ;;  %s681_s18 = sphi %s721_s18, %s866_s18   ;;  %s677_s17 = sphi %s719_s17, %s865_s17   ;;  %s673_s16 = sphi %s717_s16, %s864_s16   ;;  %s669_s15 = sphi %s715_s15, %s863_s15   ;;  %s665_s14 = sphi %s713_s14, %s862_s14  }
   0x7   : > { %s29_s21 = sadd.s32 1, %s681_s18  ;;  %s111_s22 = sadd.s32 1, %s673_s16 }
   0x8   : > { %p31_p0 = scmp.ge.s32.totalorder %s29_s21, 3  ;;  %p121_p1 = scmp.ne.s32.totalorder %s673_s16, %s669_s15 }
   0x9   : > { %p122_p2 = scmp.eq.s32.totalorder %s467_s2, 2  ;;  %p127_p3 = scmp.ne.s32.totalorder %s669_s15, %s665_s14 }
   0xa   : > { %s868_s21 = smov (%p31_p0, %s29_s21), 0  ;;  %p128_p5 = scmp.eq.s32.totalorder %s468_s20, 2 }
   0xb   : > { %p751_p4 = por %p122_p2, %p121_p1  ;;  %s108_s24 = ssub.s32 %s681_s18, %s868_s21 }
   0xc   : > { %p472_p6 = scmp.ge.s32.totalorder %s685_s19, 1  ;;  %p109_p7 = scmp.eq.s32.totalorder %s108_s24, 0 }
   0xd   : > { %p758_p8 = por %p128_p5, %p127_p3  ;;  %p175_p9 = scmp.lt.s32.totalorder %s685_s19, 4 }
   0xe   : > { %s764_s26 = scalar_select %p109_p7, %s673_s16, %s111_s22  }
   0xf   : > { %p176_p10 = pnand %p472_p6, %p175_p9 }
  0x10   : > { %s766_s27 = sshll.u32 (!%p176_p10), %s677_s17, 4  ;;  %s245_s8 = sld [smem:[#allocation2]] (!%p176_p10) }
  0x11   : > { %179 = sbr.rel (%p176_p10) target bundleno = 330 (0x14a), region = 32  ;;  %p213_p11 = scmp.lt.s32.totalorder (!%p176_p10), %s766_s27, 37 }
  0x12   : > { %s206_s9 = sand.u32 (!%p176_p10), 1, %s669_s15   ;;  %s816_s17 = scalar_lea.hbm (!%p176_p10), %s859_s3, %s766_s27 }
  0x13   : > { %s207_s10 = scalar_lea.vmem (!%p176_p10), [#allocation3], %s206_s9  ;;  %s377_s2 = scalar_lea.sflag (!%p176_p10), [#allocation4], %s206_s9 }
  0x14   : > { %s389_s11 = sshll.u32 (!%p176_p10), %s207_s10, 4  ;;  %s689_s22 = smov (!%p176_p10), [#allocation3]   ;;  %s390_s11 = int_to_ptr.vmem [resolvable:$true] %s389_s11 }
  0x15   : > { %s609_s20 = scalar_lea.vmem (!%p176_p10), %s390_s11, 16  ;;  %s613_s24 = sshll.u32 (!%p176_p10), %s689_s22, 4  ;;  %s614_s24 = int_to_ptr.vmem [resolvable:$false] %s613_s24 }
  0x16   : > { %v687_v0 = vmov 0.0   ;;  %vm688_vm0 = vmmov 0   ;;  %s214_s28 = scalar_select %p213_p11, %s766_s27, 37  ;;  %vm247_vm1 = vcmask 261120   ;;  %v228_v17 = vld [vmem:[%s857_s1] sm:$0x1]  ;;  %v246_v18 = vstv %s245_s8 }
  0x17   : > { %513 = vmatprep.subr.mxu0 %v687_v0  ;;  %545 = vmatprep.mubr.msk.f32.mxu0 %vm688_vm0, %v687_v0  ;;  %p610_p12 = scmp.ne.s32.totalorder %s390_s11, %s609_s20  ;;  %p616_p1 = scmp.lt.s32.totalorder %s390_s11, %s614_s24 }
  0x18   : > { %s474_s29 = sshll.u32 %s214_s28, 3  ;;  %s615_s28 = scalar_lea.vmem %s614_s24, 32 }
  0x19   : > { %s773_s5 = scalar_lea.vmem %s856_s0, %s474_s29  ;;  %p611_p13 = pnand %p610_p12, %p751_p4 }
  0x1a   : > { %v244_v1 = vld [vmem:[%s773_s5 + $0x78] sm:$0xff]  ;;  %v243_v2 = vld [vmem:[%s773_s5 + $0x70] sm:$0xff]  ;;  %v242_v3 = vld [vmem:[%s773_s5 + $0x68] sm:$0xff]  ;;  %p617_p2 = scmp.lt.s32.totalorder %s615_s28, %s609_s20 }
  0x1b   : > { %514 = vmatpush3.xpose.msk.msra.mxu0 %vm247_vm1, %v244_v1  ;;  %v241_v4 = vld [vmem:[%s773_s5 + $0x60] sm:$0xff]  ;;  %v240_v5 = vld [vmem:[%s773_s5 + $0x58] sm:$0xff]  ;;  %v239_v6 = vld [vmem:[%s773_s5 + $0x50] sm:$0xff]  ;;  %p612_p0 = pneg %p611_p13 }
  0x1c   : > { %515 = vmatprep.subr.mxu0 %v687_v0  ;;  %v238_v7 = vld [vmem:[%s773_s5 + $0x48] sm:$0xff]  ;;  %v237_v8 = vld [vmem:[%s773_s5 + $0x40] sm:$0xff]  ;;  %v236_v9 = vld [vmem:[%s773_s5 + $0x38] sm:$0xff]  ;;  %p618_p3 = por %p617_p2, %p616_p1 }
  0x1d   : > { %v235_v10 = vld [vmem:[%s773_s5 + $0x30] sm:$0xff]  ;;  %v234_v11 = vld [vmem:[%s773_s5 + $0x28] sm:$0xff]  ;;  %v233_v12 = vld [vmem:[%s773_s5 + $0x20] sm:$0xff] }
  0x1e   : > { %v232_v13 = vld [vmem:[%s773_s5 + $0x18] sm:$0xff]  ;;  %v231_v14 = vld [vmem:[%s773_s5 + $0x10] sm:$0xff]  ;;  %v230_v15 = vld [vmem:[%s773_s5 + $0x8] sm:$0xff]  ;;  %p619_p5 = pnand %p618_p3, %p612_p0 }
  0x1f   : > { %516 = vmatpush3.xpose.msk.msra.mxu0 %vm247_vm1, %v243_v2  ;;  %v229_v16 = vld [vmem:[%s773_s5] sm:$0xff] }
  0x20   : > { %517 = vmatprep.subr.mxu0 %v687_v0 }
  0x23   : > { %518 = vmatpush3.xpose.msk.msra.mxu0 %vm247_vm1, %v242_v3 }
  0x24   : > { %519 = vmatprep.subr.mxu0 %v687_v0 }
  0x27   : > { %520 = vmatpush3.xpose.msk.msra.mxu0 %vm247_vm1, %v241_v4 }
  0x28   : > { %521 = vmatprep.subr.mxu0 %v687_v0 }
  0x2b   : > { %522 = vmatpush3.xpose.msk.msra.mxu0 %vm247_vm1, %v240_v5 }
  0x2c   : > { %523 = vmatprep.subr.mxu0 %v687_v0 }
  0x2f   : > { %524 = vmatpush3.xpose.msk.msra.mxu0 %vm247_vm1, %v239_v6 }
  0x30   : > { %525 = vmatprep.subr.mxu0 %v687_v0 }
  0x33   : > { %526 = vmatpush3.xpose.msk.msra.mxu0 %vm247_vm1, %v238_v7 }
  0x34   : > { %527 = vmatprep.subr.mxu0 %v687_v0 }
  0x37   : > { %528 = vmatpush3.xpose.msk.msra.mxu0 %vm247_vm1, %v237_v8 }
  0x38   : > { %529 = vmatprep.subr.mxu0 %v687_v0 }
  0x3b   : > { %530 = vmatpush3.xpose.msk.msra.mxu0 %vm247_vm1, %v236_v9 }
  0x3c   : > { %531 = vmatprep.subr.mxu0 %v687_v0 }
  0x3f   : > { %532 = vmatpush3.xpose.msk.msra.mxu0 %vm247_vm1, %v235_v10 }
  0x40   : > { %533 = vmatprep.subr.mxu0 %v687_v0 }
  0x43   : > { %534 = vmatpush3.xpose.msk.msra.mxu0 %vm247_vm1, %v234_v11 }
  0x44   : > { %535 = vmatprep.subr.mxu0 %v687_v0 }
  0x47   : > { %536 = vmatpush3.xpose.msk.msra.mxu0 %vm247_vm1, %v233_v12 }
  0x48   : > { %537 = vmatprep.subr.mxu0 %v687_v0 }
  0x4b   : > { %538 = vmatpush3.xpose.msk.msra.mxu0 %vm247_vm1, %v232_v13 }
  0x4c   : > { %539 = vmatprep.subr.mxu0 %v687_v0 }
  0x4f   : > { %540 = vmatpush3.xpose.msk.msra.mxu0 %vm247_vm1, %v231_v14 }
  0x50   : > { %541 = vmatprep.subr.mxu0 %v687_v0 }
  0x53   : > { %542 = vmatpush3.xpose.msk.msra.mxu0 %vm247_vm1, %v230_v15 }
  0x54   : > { %543 = vmatprep.subr.mxu0 %v687_v0 }
  0x57   : > { %544 = vmatpush3.xpose.msk.msra.mxu0 %vm247_vm1, %v229_v16 }
  0x5a   : > { %546 = vmatmul.mubr.msk.f32.vlgmr.msra.gmra.mxu0 %vm247_vm1, %v228_v17 }
 0x11a   : > { %v365_v19 = vpop.f32.mrf.mxu0 }
 0x11b   : > { %v366_v20 = vadd.f32 %v365_v19, %v246_v18 }
 0x11c   : > { %v547_v21 = vpop.f32.mrf.mxu0 }
 0x11d   : > { %v492_v22 = vmul.f32 -1.442695, %v366_v20 }
 0x11f   : > { %605 = vpow2.f32 %v492_v22 }
 0x12c   : > { %v606_v23 = vpop.eup %605 }
 0x12d   : > { %v372_v24 = vadd.f32 1.0, %v606_v23 }
 0x12f   : > { %607 = vrcp.f32 %v372_v24 }
 0x13c   : > { %v608_v25 = vpop.eup %607 }
 0x13d   : > { %375 = vst [vmem:[%s207_s10] sm:$0x1] %v608_v25 }
 0x13e   : > { %622 = shalt.err (!%p619_p5)
}
 0x13f   : > { %s623_s27 = scalar_lea.hbm %s816_s17, 16  ;;  %s627_s4 = scalar_lea.hbm %s859_s3, 48 }
 0x140   : > { %p624_p6 = scmp.ne.s32.totalorder %s816_s17, %s623_s27  ;;  %p628_p10 = scmp.lt.s32.totalorder %s816_s17, %s859_s3 }
 0x141   : > { %p629_p11 = scmp.lt.s32.totalorder %s627_s4, %s623_s27 }
 0x142   : > { %p625_p7 = pnand %p624_p6, %p751_p4 }
 0x143   : > { %p630_p12 = por %p629_p11, %p628_p10 }
 0x144   : > { %p626_p9 = pneg %p625_p7 }
 0x146   : > { %p631_p13 = pnand %p630_p12, %p626_p9 }
 0x148   : > { %634 = shalt.err (!%p631_p13)
}
 0x149   : > { %548 = dma.vmem_to_hbm [thread:$0]  (%p751_p4), %s390_s11, 16, %s816_s17, %s377_s2  }
 0x14a PF: > { %p554_p0 = scmp.ge.s32.totalorder %s685_s19, 2  ;;  %s401_s7 = sand.u32 1, %s665_s14  }
 0x14b   : > { %s402_s8 = scalar_lea.sflag [#allocation4], %s401_s7 }
 0x14c   : > { %p551_p1 = pnand %p554_p0, %p758_p8 }
 0x14e   : > { %p552_p2 = pneg %p551_p1 }
 0x150   : > { %660 = dma.done.wait (%p552_p2), %s402_s8, 16  }
 0x151   : > { %662 = vsyncadd (%p552_p2), %s402_s8, 4294967280  ;;  %s17_s19 = sadd.s32 1, %s685_s19   ;;  %s862_s14 = smov %s669_s15 }
 0x152   : > { %p14_p3 = scmp.ge.s32.totalorder %s17_s19, 5   ;;  %s863_s15 = smov %s673_s16 }
 0x153   : > { %s864_s16 = smov %s764_s26  ;;  %s865_s17 = smov %s681_s18 }
 0x154   : > { %s866_s18 = smov %s868_s21  ;;  %16 = sbr.rel (!%p14_p3) target bundleno = 6 (0x6), region = 70 }
 0x159   :  { %406 = vsyncpa [#allocation4], 1 }
 0x15a   :  { %408 = vsyncpa [#allocation4 + $0x1], 1 }

</bundles_post_ra>
